<compile_context>
chip_gen: v7x
topology: tpu7x:2x2x1
jax: 0.10.0
libtpu: 0.0.40
codegen_flags: <defaults>
</compile_context>

<pallas_src>
import functools

import jax
import jax.numpy as jnp
from jax.experimental import pallas as pl
from jax.experimental.pallas import tpu as pltpu

_LANES = 128
_SUB = 8


def _bce_kernel(x_ref, t_ref, loss_ref, corr_ref, *,
                total, block_rows, blocks_per_split):
    c = pl.program_id(0)          # parallel split (megacore axis on v7x)
    i = pl.program_id(1)          # reduction axis over row blocks

    @pl.when(i == 0)
    def _():
        loss_ref[...] = jnp.zeros_like(loss_ref)
        corr_ref[...] = jnp.zeros_like(corr_ref)

    x = x_ref[...].astype(jnp.float32)
    t = t_ref[...].astype(jnp.float32)

    # Mask off padded tail elements (flat index >= true element count).
    row = jax.lax.broadcasted_iota(jnp.int32, (block_rows, _LANES), 0)
    lane = jax.lax.broadcasted_iota(jnp.int32, (block_rows, _LANES), 1)
    row_off = (c * blocks_per_split + i) * block_rows
    flat = (row_off + row) * _LANES + lane
    valid = flat < total

    # Fused-logits BCE: == -t*log(sigmoid(x)) - (1-t)*log(1-sigmoid(x)),
    # finite for all x, 2 EUP transcendentals per element (exp, log).
    loss = jnp.maximum(x, 0.0) - x * t + jnp.log(1.0 + jnp.exp(-jnp.abs(x)))

    # sigmoid(x) >= 0.5  <=>  x >= 0 ; keep torch's exact float equality check.
    pred = (x >= 0.0).astype(jnp.float32)
    correct = (pred == t).astype(jnp.float32)

    loss = jnp.where(valid, loss, 0.0)
    correct = jnp.where(valid, correct, 0.0)

    # Pure-VPU partial reduction into the resident (1, 8, 128) output block.
    g = block_rows // _SUB
    loss_ref[...] += loss.reshape(1, g, _SUB, _LANES).sum(axis=1)
    corr_ref[...] += correct.reshape(1, g, _SUB, _LANES).sum(axis=1)


def _ceil_div(a, b):
    return -(-a // b)


def custom_bce_loss(inputs, target, *, block_rows=1024, num_splits=2):
    """Pallas implementation of CustomBCELoss.forward.

    Returns (loss, accuracy) as f32 scalars.
    block_rows: rows of 128 lanes per pipelined block (default 512 KiB f32/operand).
    num_splits: leading 'parallel' grid axis (2 -> both v7x TensorCores).
    """
    assert inputs.shape == target.shape
    n_first_dim = target.shape[0]          # len(target) in the PyTorch module
    total = inputs.size                    # denominator of torch.mean

    x = inputs.reshape(-1)
    t = target.reshape(-1)

    # Static tiling math (shapes are static at trace time).
    rows = _ceil_div(total, _LANES)
    rows = _ceil_div(rows, _SUB) * _SUB
    block_rows = max(_SUB, min(block_rows, rows))
    block_rows = _ceil_div(block_rows, _SUB) * _SUB
    n_blocks = _ceil_div(rows, block_rows)
    splits = max(1, min(num_splits, n_blocks))
    n_blocks = _ceil_div(n_blocks, splits) * splits
    rows = n_blocks * block_rows
    padded = rows * _LANES

    if padded != total:                    # pad tail; masked inside the kernel
        x = jnp.pad(x, (0, padded - total))
        t = jnp.pad(t, (0, padded - total))

    # Keep original dtype in HBM; upcast inside the kernel.
    x2 = x.reshape(rows, _LANES)
    t2 = t.reshape(rows, _LANES)

    blocks_per_split = n_blocks // splits
    grid = (splits, blocks_per_split)

    kernel = functools.partial(
        _bce_kernel, total=total, block_rows=block_rows,
        blocks_per_split=blocks_per_split)

    in_spec = pl.BlockSpec((block_rows, _LANES),
                           lambda c, i: (c * blocks_per_split + i, 0))
    out_spec = pl.BlockSpec((1, _SUB, _LANES), lambda c, i: (c, 0, 0))

    # VMEM budget: 2 inputs x 2 buffers x block_rows*128*itemsize  (512 KiB
    # blocks -> ~2 MiB), far under the 16/32 MiB scoped default on all chips.
    loss_parts, corr_parts = pl.pallas_call(
        kernel,
        out_shape=(jax.ShapeDtypeStruct((splits, _SUB, _LANES), jnp.float32),
                   jax.ShapeDtypeStruct((splits, _SUB, _LANES), jnp.float32)),
        grid=grid,
        in_specs=[in_spec, in_spec],
        out_specs=(out_spec, out_spec),
        compiler_params=pltpu.CompilerParams(
            dimension_semantics=("parallel", "arbitrary")),
    )(x2, t2)

    # Tiny final cross-lane reduce (2 * splits * 1024 floats) done by XLA.
    loss = jnp.sum(loss_parts) / jnp.float32(total)
    correct = jnp.sum(corr_parts)
    accuracy = correct / jnp.float32(n_first_dim)
    # TODO(synk): torch returns accuracy via .item() (host float); we return a
    # device f32 scalar instead.
    return loss, accuracy


def _reference(inputs, target):
    s = jax.nn.sigmoid(inputs.astype(jnp.float32))
    t = target.astype(jnp.float32)
    loss = jnp.mean(-t * jnp.log(s) - (1.0 - t) * jnp.log(1.0 - s))
    pred = (s >= 0.5).astype(jnp.float32)
    acc = jnp.sum((pred == t).astype(jnp.float32)) / target.shape[0]
    return loss, acc


if __name__ == "__main__":
    key = jax.random.PRNGKey(0)
    k1, k2 = jax.random.split(key)

    N = 4000  # deliberately NOT a multiple of 128 to exercise tail masking
    inputs = jax.random.normal(k1, (N,), dtype=jnp.float32)
    target = (jax.random.uniform(k2, (N,)) > 0.5).astype(jnp.float32)

    # Default path (single block per split).
    loss, acc = custom_bce_loss(inputs, target)
    # Tiny-block path: exercises the (splits=2, multi-block) accumulation grid.
    loss2, acc2 = custom_bce_loss(inputs, target, block_rows=8, num_splits=2)

    loss, acc, loss2, acc2 = jax.block_until_ready((loss, acc, loss2, acc2))

    ref_loss, ref_acc = _reference(inputs, target)
    assert jnp.allclose(loss, ref_loss, rtol=1e-5, atol=1e-5), (loss, ref_loss)
    assert jnp.allclose(acc, ref_acc, rtol=1e-6, atol=1e-6), (acc, ref_acc)
    assert jnp.allclose(loss2, ref_loss, rtol=1e-5, atol=1e-5), (loss2, ref_loss)
    assert jnp.allclose(acc2, ref_acc, rtol=1e-6, atol=1e-6), (acc2, ref_acc)

    print("KERNEL_OK")
</pallas_src>

<mosaic_0001>
module attributes {stable_mosaic.version = 11 : i64} {
  func.func @_bce_kernel(%arg0: i32, %arg1: i32, %arg2: memref<32x128xf32, #tpu.memory_space<vmem>>, %arg3: memref<32x128xf32, #tpu.memory_space<vmem>>, %arg4: memref<1x8x128xf32, #tpu.memory_space<vmem>>, %arg5: memref<1x8x128xf32, #tpu.memory_space<vmem>>) attributes {dimension_semantics = [#tpu.dimension_semantics<parallel>, #tpu.dimension_semantics<arbitrary>], iteration_bounds = array<i64: 1, 1>, scalar_prefetch = 0 : i64, scratch_operands = 0 : i64, tpu.core_type = #tpu.core_type<tc>, window_params = [{transform_indices = @transform_0, window_bounds = array<i64: 32, 128>}, {transform_indices = @transform_1, window_bounds = array<i64: 32, 128>}, {transform_indices = @transform_2, window_bounds = array<i64: 1, 8, 128>}, {transform_indices = @transform_3, window_bounds = array<i64: 1, 8, 128>}]} {
    %c0_i32 = arith.constant 0 : i32
    %0 = arith.cmpi eq, %arg1, %c0_i32 : i32
    %1 = arith.extui %0 : i1 to i32
    %c0_i32_0 = arith.constant 0 : i32
    %2 = arith.cmpi ne, %1, %c0_i32_0 : i32
    scf.if %2 {
      %cst_23 = arith.constant 0.000000e+00 : f32
      %50 = vector.broadcast %cst_23 : f32 to vector<1x8x128xf32>
      %c0_24 = arith.constant 0 : index
      %c0_25 = arith.constant 0 : index
      %c0_26 = arith.constant 0 : index
      %51 = vector.load %arg4[%c0_24, %c0_25, %c0_26] : memref<1x8x128xf32, #tpu.memory_space<vmem>>, vector<1x8x128xf32>
      tpu.vector_store %arg4[%c0_24, %c0_25, %c0_26], %50 {strides = array<i32>} : memref<1x8x128xf32, #tpu.memory_space<vmem>>, vector<1x8x128xf32>,
      %cst_27 = arith.constant 0.000000e+00 : f32
      %52 = vector.broadcast %cst_27 : f32 to vector<1x8x128xf32>
      %c0_28 = arith.constant 0 : index
      %c0_29 = arith.constant 0 : index
      %c0_30 = arith.constant 0 : index
      %53 = vector.load %arg5[%c0_28, %c0_29, %c0_30] : memref<1x8x128xf32, #tpu.memory_space<vmem>>, vector<1x8x128xf32>
      tpu.vector_store %arg5[%c0_28, %c0_29, %c0_30], %52 {strides = array<i32>} : memref<1x8x128xf32, #tpu.memory_space<vmem>>, vector<1x8x128xf32>,
    } else {
    }
    %c0 = arith.constant 0 : index
    %c0_1 = arith.constant 0 : index
    %3 = vector.load %arg2[%c0, %c0_1] : memref<32x128xf32, #tpu.memory_space<vmem>>, vector<32x128xf32>
    %c0_2 = arith.constant 0 : index
    %c0_3 = arith.constant 0 : index
    %4 = vector.load %arg3[%c0_2, %c0_3] : memref<32x128xf32, #tpu.memory_space<vmem>>, vector<32x128xf32>
    %5 = tpu.iota {dimensions = array<i32: 0>} : vector<32x128xi32>
    %6 = tpu.iota {dimensions = array<i32: 1>} : vector<32x128xi32>
    %c1_i32 = arith.constant 1 : i32
    %7 = arith.muli %arg0, %c1_i32 : i32
    %8 = arith.addi %7, %arg1 : i32
    %c32_i32 = arith.constant 32 : i32
    %9 = arith.muli %8, %c32_i32 : i32
    %10 = vector.broadcast %9 : i32 to vector<32x128xi32>
    %11 = arith.addi %10, %5 : vector<32x128xi32>
    %c128_i32 = arith.constant 128 : i32
    %12 = vector.broadcast %c128_i32 : i32 to vector<32x128xi32>
    %13 = arith.muli %11, %12 : vector<32x128xi32>
    %14 = arith.addi %13, %6 : vector<32x128xi32>
    %c4000_i32 = arith.constant 4000 : i32
    %15 = vector.broadcast %c4000_i32 : i32 to vector<32x128xi32>
    %16 = arith.cmpi slt, %14, %15 : vector<32x128xi32>
    %cst = arith.constant 0.000000e+00 : f32
    %17 = vector.broadcast %cst : f32 to vector<32x128xf32>
    %18 = arith.maximumf %3, %17 : vector<32x128xf32>
    %19 = arith.mulf %3, %4 : vector<32x128xf32>
    %20 = arith.subf %18, %19 : vector<32x128xf32>
    %21 = math.absf %3 : vector<32x128xf32>
    %cst_4 = arith.constant 0.000000e+00 : f32
    %22 = vector.broadcast %cst_4 : f32 to vector<32x128xf32>
    %23 = arith.subf %22, %21 : vector<32x128xf32>
    %24 = math.exp %23 : vector<32x128xf32>
    %cst_5 = arith.constant 1.000000e+00 : f32
    %25 = vector.broadcast %cst_5 : f32 to vector<32x128xf32>
    %26 = arith.addf %25, %24 : vector<32x128xf32>
    %27 = math.log %26 : vector<32x128xf32>
    %28 = arith.addf %20, %27 : vector<32x128xf32>
    %cst_6 = arith.constant 0.000000e+00 : f32
    %29 = vector.broadcast %cst_6 : f32 to vector<32x128xf32>
    %30 = arith.cmpf oge, %3, %29 : vector<32x128xf32>
    %31 = arith.extui %30 : vector<32x128xi1> to vector<32x128xi32>
    %32 = arith.sitofp %31 : vector<32x128xi32> to vector<32x128xf32>
    %33 = arith.cmpf oeq, %32, %4 : vector<32x128xf32>
    %34 = arith.extui %33 : vector<32x128xi1> to vector<32x128xi32>
    %35 = arith.sitofp %34 : vector<32x128xi32> to vector<32x128xf32>
    %cst_7 = arith.constant 0.000000e+00 : f32
    %36 = vector.broadcast %cst_7 : f32 to vector<32x128xf32>
    %37 = arith.select %16, %28, %36 : vector<32x128xi1>, vector<32x128xf32>
    %cst_8 = arith.constant 0.000000e+00 : f32
    %38 = vector.broadcast %cst_8 : f32 to vector<32x128xf32>
    %39 = arith.select %16, %35, %38 : vector<32x128xi1>, vector<32x128xf32>
    %c0_9 = arith.constant 0 : index
    %c0_10 = arith.constant 0 : index
    %c0_11 = arith.constant 0 : index
    %40 = vector.load %arg4[%c0_9, %c0_10, %c0_11] : memref<1x8x128xf32, #tpu.memory_space<vmem>>, vector<1x8x128xf32>
    %41 = vector.shape_cast %37 : vector<32x128xf32> to vector<1x4x8x128xf32>
    %cst_12 = arith.constant dense<0.000000e+00> : vector<1x8x128xf32>
    %42 = vector.multi_reduction <add>, %41, %cst_12 [1] : vector<1x4x8x128xf32> to vector<1x8x128xf32>
    %43 = arith.addf %40, %42 : vector<1x8x128xf32>
    %c0_13 = arith.constant 0 : index
    %c0_14 = arith.constant 0 : index
    %c0_15 = arith.constant 0 : index
    %44 = vector.load %arg4[%c0_13, %c0_14, %c0_15] : memref<1x8x128xf32, #tpu.memory_space<vmem>>, vector<1x8x128xf32>
    tpu.vector_store %arg4[%c0_13, %c0_14, %c0_15], %43 {strides = array<i32>} : memref<1x8x128xf32, #tpu.memory_space<vmem>>, vector<1x8x128xf32>,
    %c0_16 = arith.constant 0 : index
    %c0_17 = arith.constant 0 : index
    %c0_18 = arith.constant 0 : index
    %45 = vector.load %arg5[%c0_16, %c0_17, %c0_18] : memref<1x8x128xf32, #tpu.memory_space<vmem>>, vector<1x8x128xf32>
    %46 = vector.shape_cast %39 : vector<32x128xf32> to vector<1x4x8x128xf32>
    %cst_19 = arith.constant dense<0.000000e+00> : vector<1x8x128xf32>
    %47 = vector.multi_reduction <add>, %46, %cst_19 [1] : vector<1x4x8x128xf32> to vector<1x8x128xf32>
    %48 = arith.addf %45, %47 : vector<1x8x128xf32>
    %c0_20 = arith.constant 0 : index
    %c0_21 = arith.constant 0 : index
    %c0_22 = arith.constant 0 : index
    %49 = vector.load %arg5[%c0_20, %c0_21, %c0_22] : memref<1x8x128xf32, #tpu.memory_space<vmem>>, vector<1x8x128xf32>
    tpu.vector_store %arg5[%c0_20, %c0_21, %c0_22], %48 {strides = array<i32>} : memref<1x8x128xf32, #tpu.memory_space<vmem>>, vector<1x8x128xf32>,
    return
  }
  func.func @transform_0(%arg0: i32, %arg1: i32) -> (i32, i32) {
    %c1_i32 = arith.constant 1 : i32
    %0 = arith.muli %arg0, %c1_i32 : i32
    %1 = arith.addi %0, %arg1 : i32
    %c0_i32 = arith.constant 0 : i32
    %c0_i32_0 = arith.constant 0 : i32
    return %1, %c0_i32 : i32, i32
  }
  func.func @transform_1(%arg0: i32, %arg1: i32) -> (i32, i32) {
    %c1_i32 = arith.constant 1 : i32
    %0 = arith.muli %arg0, %c1_i32 : i32
    %1 = arith.addi %0, %arg1 : i32
    %c0_i32 = arith.constant 0 : i32
    %c0_i32_0 = arith.constant 0 : i32
    return %1, %c0_i32 : i32, i32
  }
  func.func @transform_2(%arg0: i32, %arg1: i32) -> (i32, i32, i32) {
    %c0_i32 = arith.constant 0 : i32
    %c0_i32_0 = arith.constant 0 : i32
    %c0_i32_1 = arith.constant 0 : i32
    return %arg0, %c0_i32, %c0_i32_0 : i32, i32, i32
  }
  func.func @transform_3(%arg0: i32, %arg1: i32) -> (i32, i32, i32) {
    %c0_i32 = arith.constant 0 : i32
    %c0_i32_0 = arith.constant 0 : i32
    %c0_i32_1 = arith.constant 0 : i32
    return %arg0, %c0_i32, %c0_i32_0 : i32, i32, i32
  }
}

</mosaic_0001>

<bundles_post_ra>
// kernel: tpu_custom_call.1
= control target key start
LH: loop header
LB: loop body
LE: loop exit
PB: predicated region body
PF: predicated region fallthrough
CT: control target
= control target key end

     0   :  { %9 = vsyncpa [#allocation3], 0  ;;  %s471_s0 = inlined_call_operand.hbm [shape: f32[32,128], index: 0, kind: input, shape index: {}]   ;;  %s472_s1 = inlined_call_operand.hbm [shape: f32[32,128], index: 1, kind: input, shape index: {}]   ;;  %s473_s2 = inlined_call_operand.hbm [shape: f32[1,8,128], index: 2, kind: output, shape index: {0}]   ;;  %s474_s3 = inlined_call_operand.hbm [shape: f32[1,8,128], index: 3, kind: output, shape index: {1}]  }
   0x1   :  { %10 = vsyncpa [#allocation6], 0 }
   0x2   :  { %11 = vsyncpa [#allocation4], 0 }
   0x3   :  { %12 = vsyncpa [#allocation9], 0  ;;  %s340_s12 = smov [#allocation2]   ;;  %s244_s16 = scalar_lea.hbm %s471_s0, 512 }
   0x4   :  { %s22_s13 = sshll.u32 %s340_s12, 4  ;;  %p245_p0 = scmp.ne.s32.totalorder %s471_s0, %s244_s16  ;;  %s23_s13 = int_to_ptr.vmem [resolvable:$true] %s22_s13 }
   0x5   :  { %p248_p1 = scmp.lt.u32.totalorder %s244_s16, %s471_s0 }
   0x7   :  { %p250_p2 = pnand %p248_p1, %p245_p0 }
   0x9   :  { %253 = shalt.err (!%p250_p2)
}
   0xa   :  { %s254_s21 = scalar_lea.vmem %s23_s13, 512  ;;  %p259_p4 = scmp.lt.s32.totalorder %s23_s13, %s23_s13 }
   0xb   :  { %p255_p3 = scmp.ne.s32.totalorder %s23_s13, %s254_s21  ;;  %p260_p5 = scmp.lt.s32.totalorder %s254_s21, %s254_s21 }
   0xd   :  { %p261_p6 = por %p260_p5, %p259_p4 }
   0xf   :  { %p262_p7 = pnand %p261_p6, %p255_p3 }
  0x11   :  { %265 = shalt.err (!%p262_p7)
}
  0x12   :  { %s341_s22 = smov 128   ;;  %s342_s23 = smov 8  }
  0x13   :  { %28 = dma.hbm_to_vmem [thread:$0]  %s471_s0, 512, %s23_s13, [#allocation3], %s341_s22, %s341_s22, %s342_s23  }
  0x14   :  { %s343_s26 = smov [#allocation5]   ;;  %s266_s30 = scalar_lea.hbm %s472_s1, 512 }
  0x15   :  { %s38_s27 = sshll.u32 %s343_s26, 4  ;;  %p267_p8 = scmp.ne.s32.totalorder %s472_s1, %s266_s30  ;;  %s39_s27 = int_to_ptr.vmem [resolvable:$true] %s38_s27 }
  0x16   :  { %p270_p9 = scmp.lt.u32.totalorder %s266_s30, %s472_s1 }
  0x18   :  { %p272_p10 = pnand %p270_p9, %p267_p8 }
  0x1a   :  { %275 = shalt.err (!%p272_p10)
}
  0x1b   :  { %s276_s8 = scalar_lea.vmem %s39_s27, 512  ;;  %p281_p12 = scmp.lt.s32.totalorder %s39_s27, %s39_s27 }
  0x1c   :  { %p277_p11 = scmp.ne.s32.totalorder %s39_s27, %s276_s8  ;;  %p282_p13 = scmp.lt.s32.totalorder %s276_s8, %s276_s8 }
  0x1e   :  { %p283_p0 = por %p282_p13, %p281_p12 }
  0x20   :  { %p284_p1 = pnand %p283_p0, %p277_p11 }
  0x22   :  { %287 = shalt.err (!%p284_p1)
}
  0x23   :  { %44 = dma.hbm_to_vmem [thread:$0]  %s472_s1, 512, %s39_s27, [#allocation6], %s341_s22, %s341_s22, %s342_s23  }
  0x24   :  { %332 = dma.done.wait [#allocation3], 512  }
  0x25   :  { %333 = vsyncadd [#allocation3], 4294966784 }
  0x26   :  { %334 = dma.done.wait [#allocation6], 512  }
  0x27   :  { %335 = vsyncadd [#allocation6], 4294966784  ;;  %v69_v0 = vlaneseq  ;;  %v391_v10 = vld [vmem:[#allocation2] sm:$0xff]  ;;  %v397_v13 = vld [vmem:[#allocation2 + $0x8] sm:$0xff]  ;;  %v344_v30 = vmov 0.0   ;;  %s345_s1 = smov [#allocation8]  }
  0x28   :  { %v399_v14 = vld [vmem:[#allocation2 + $0x10] sm:$0xff]  ;;  %v405_v17 = vld [vmem:[#allocation2 + $0x18] sm:$0xff]  ;;  %v107_v18 = vand.u32 2147483647, %v391_v10  ;;  %v108_v19 = vand.u32 2147483647, %v397_v13 }
  0x29   :  { %v70_v1 = vshrl.u32 %v69_v0, 7  ;;  %v75_v2 = vand.u32 127, %v69_v0  ;;  %v109_v20 = vand.u32 2147483647, %v399_v14  ;;  %v110_v21 = vand.u32 2147483647, %v405_v17 }
  0x2a   :  { %v111_v22 = vsub.f32 0.0, %v107_v18  ;;  %v112_v23 = vsub.f32 0.0, %v108_v19  ;;  %vm139_vm4 = vcmp.ge.f32.partialorder %v391_v10, 0.0  ;;  %vm140_vm5 = vcmp.ge.f32.partialorder %v397_v13, 0.0  ;;  %v417_v25 = vld [vmem:[#allocation5] sm:$0xff]  ;;  %v66_v33 = vld [vmem:[#allocation5 + $0x8] sm:$0xff] }
  0x2b   :  { %v71_v3 = vadd.s32 8, %v70_v1  ;;  %v72_v4 = vadd.s32 16, %v70_v1  ;;  %v73_v5 = vadd.s32 24, %v70_v1  ;;  %v83_v6 = vmul.u32 128, %v70_v1  ;;  %v67_v34 = vld [vmem:[#allocation5 + $0x10] sm:$0xff]  ;;  %v68_v38 = vld [vmem:[#allocation5 + $0x18] sm:$0xff] }
  0x2c   :  { %v113_v24 = vsub.f32 0.0, %v109_v20  ;;  %v114_v26 = vsub.f32 0.0, %v110_v21  ;;  %v115_v27 = vmul.f32 1.442695, %v111_v22  ;;  %vm141_vm6 = vcmp.ge.f32.partialorder %v399_v14, 0.0  ;;  %s199_s10 = sshll.u32 %s345_s1, 4  ;;  %s200_s10 = int_to_ptr.vmem [resolvable:$true] %s199_s10 }
  0x2d   :  { %v84_v7 = vmul.u32 128, %v71_v3  ;;  %v85_v8 = vmul.u32 128, %v72_v4  ;;  %v393_v11 = vadd.s32 %v83_v6, %v75_v2  ;;  %vm142_vm7 = vcmp.ge.f32.partialorder %v405_v17, 0.0  ;;  %s288_s11 = scalar_lea.vmem %s200_s10, 128  ;;  %p293_p3 = scmp.lt.s32.totalorder %s200_s10, %s200_s10 }
  0x2e   :  { %v86_v9 = vmul.u32 128, %v73_v5  ;;  %v117_v28 = vmul.f32 1.442695, %v112_v23  ;;  %v119_v29 = vmul.f32 1.442695, %v113_v24  ;;  %v213_v31 = vsel %vm139_vm4, 1.0, %v344_v30  ;;  %p289_p2 = scmp.ne.s32.totalorder %s200_s10, %s288_s11  ;;  %p294_p4 = scmp.lt.s32.totalorder %s288_s11, %s288_s11 }
  0x2f   :  { %v395_v12 = vadd.s32 %v84_v7, %v75_v2  ;;  %v401_v15 = vadd.s32 %v85_v8, %v75_v2  ;;  %vm91_vm0 = vcmp.lt.s32.totalorder %v393_v11, 4000  ;;  %v214_v32 = vsel %vm140_vm5, 1.0, %v344_v30 }
  0x30   :  { %v403_v16 = vadd.s32 %v86_v9, %v75_v2  ;;  %228 = vpow2.f32 %v115_v27  ;;  %v121_v35 = vmul.f32 1.442695, %v114_v26  ;;  %v215_v36 = vsel %vm141_vm6, 1.0, %v344_v30  ;;  %p295_p5 = por %p294_p4, %p293_p3 }
  0x31   :  { %vm92_vm1 = vcmp.lt.s32.totalorder %v395_v12, 4000  ;;  %vm93_vm2 = vcmp.lt.s32.totalorder %v401_v15, 4000  ;;  %v216_v37 = vsel %vm142_vm7, 1.0, %v344_v30  ;;  %230 = vpow2.f32 %v117_v28 }
  0x32   :  { %vm94_vm3 = vcmp.lt.s32.totalorder %v403_v16, 4000  ;;  %vm151_vm8 = vcmp.eq.f32.partialorder %v213_v31, %v417_v25  ;;  %vm152_vm9 = vcmp.eq.f32.partialorder %v214_v32, %v66_v33  ;;  %vm153_vm10 = vcmp.eq.f32.partialorder %v215_v36, %v67_v34  ;;  %p296_p6 = pnand %p295_p5, %p289_p2 }
  0x33   :  { %232 = vpow2.f32 %v119_v29  ;;  %vm154_vm11 = vcmp.eq.f32.partialorder %v216_v37, %v68_v38  ;;  %v217_v39 = vsel %vm151_vm8, 1.0, %v344_v30  ;;  %v218_v40 = vsel %vm152_vm9, 1.0, %v344_v30 }
  0x34   :  { %234 = vpow2.f32 %v121_v35  ;;  %v219_v41 = vsel %vm153_vm10, 1.0, %v344_v30  ;;  %v220_v42 = vsel %vm154_vm11, 1.0, %v344_v30  ;;  %v167_v43 = vsel %vm91_vm0, %v217_v39, 0.0 }
  0x35   :  { %v168_v44 = vsel %vm92_vm1, %v218_v40, 0.0  ;;  %v169_v45 = vsel %vm93_vm2, %v219_v41, 0.0  ;;  %v170_v47 = vsel %vm94_vm3, %v220_v42, 0.0 }
  0x36   :  { %v178_v46 = vadd.f32 %v168_v44, %v167_v43 }
  0x38   :  { %v179_v48 = vadd.f32 %v178_v46, %v169_v45 }
  0x3a   :  { %v180_v49 = vadd.f32 %v179_v48, %v170_v47  ;;  %v229_v50 = vpop.eup %228 }
  0x3b   :  { %v231_v51 = vpop.eup %230  ;;  %v123_v52 = vadd.f32 1.0, %v229_v50 }
  0x3c   :  { %v124_v54 = vadd.f32 1.0, %v231_v51  ;;  %182 = vst [vmem:[#allocation8] sm:$0xff] %v180_v49 }
  0x3d   :  { %v233_v53 = vpop.eup %232  ;;  %236 = vlog2.f32 %v123_v52 }
  0x3e   :  { %v235_v55 = vpop.eup %234  ;;  %v125_v56 = vadd.f32 1.0, %v233_v53  ;;  %238 = vlog2.f32 %v124_v54 }
  0x3f   :  { %v126_v57 = vadd.f32 1.0, %v235_v55 }
  0x40   :  { %299 = shalt.err (!%p296_p6)
}
  0x41   :  { %s300_s14 = scalar_lea.hbm %s474_s3, 128 }
  0x42   :  { %p301_p7 = scmp.ne.s32.totalorder %s474_s3, %s300_s14  ;;  %p304_p8 = scmp.lt.u32.totalorder %s300_s14, %s474_s3 }
  0x44   :  { %p306_p9 = pnand %p304_p8, %p301_p7 }
  0x46   :  { %309 = shalt.err (!%p306_p9)
}
  0x47   :  { %202 = dma.vmem_to_hbm [thread:$0]  %s200_s10, 128, %s474_s3, [#allocation9]   ;;  %240 = vlog2.f32 %v125_v56  ;;  %v95_v58 = vmax.f32 %v391_v10, 0.0  ;;  %v99_v59 = vmul.f32 %v417_v25, %v391_v10  ;;  %v96_v60 = vmax.f32 %v397_v13, 0.0  ;;  %v237_v3 = vpop.eup %236 }
  0x48   :  { %242 = vlog2.f32 %v126_v57  ;;  %v100_v61 = vmul.f32 %v66_v33, %v397_v13  ;;  %v97_v62 = vmax.f32 %v399_v14, 0.0  ;;  %v101_v63 = vmul.f32 %v67_v34, %v399_v14  ;;  %v239_v5 = vpop.eup %238  ;;  %s346_s3 = smov [#allocation7]  }
  0x49   :  { %v98_v0 = vmax.f32 %v405_v17, 0.0  ;;  %v102_v1 = vmul.f32 %v68_v38, %v405_v17  ;;  %v103_v2 = vsub.f32 %v95_v58, %v99_v59  ;;  %v128_v7 = vmul.f32 0.6931472, %v237_v3  ;;  %s189_s21 = sshll.u32 %s346_s3, 4  ;;  %s190_s21 = int_to_ptr.vmem [resolvable:$true] %s189_s21 }
  0x4a   :  { %v104_v4 = vsub.f32 %v96_v60, %v100_v61  ;;  %v105_v6 = vsub.f32 %v97_v62, %v101_v63  ;;  %v130_v10 = vmul.f32 0.6931472, %v239_v5  ;;  %s310_s22 = scalar_lea.vmem %s190_s21, 128  ;;  %p315_p11 = scmp.lt.s32.totalorder %s190_s21, %s190_s21 }
  0x4b   :  { %v106_v9 = vsub.f32 %v98_v0, %v102_v1  ;;  %v135_v13 = vadd.f32 %v128_v7, %v103_v2  ;;  %p311_p10 = scmp.ne.s32.totalorder %s190_s21, %s310_s22  ;;  %p316_p12 = scmp.lt.s32.totalorder %s310_s22, %s310_s22 }
  0x4c   :  { %v136_v21 = vadd.f32 %v130_v10, %v104_v4 }
  0x4d   :  { %v163_v14 = vsel %vm91_vm0, %v135_v13, 0.0  ;;  %p317_p13 = por %p316_p12, %p315_p11 }
  0x4e   :  { %v164_v17 = vsel %vm92_vm1, %v136_v21, 0.0 }
  0x4f   :  { %v172_v25 = vadd.f32 %v164_v17, %v163_v14  ;;  %p318_p0 = pnand %p317_p13, %p311_p10 }
  0x51   :  { %v241_v8 = vpop.eup %240 }
  0x52   :  { %v243_v18 = vpop.eup %242  ;;  %v132_v19 = vmul.f32 0.6931472, %v241_v8 }
  0x53   :  { %v134_v20 = vmul.f32 0.6931472, %v243_v18 }
  0x54   :  { %v137_v22 = vadd.f32 %v132_v19, %v105_v6 }
  0x55   :  { %v138_v23 = vadd.f32 %v134_v20, %v106_v9 }
  0x56   :  { %v165_v24 = vsel %vm93_vm2, %v137_v22, 0.0 }
  0x57   :  { %v166_v26 = vsel %vm94_vm3, %v138_v23, 0.0  ;;  %v173_v27 = vadd.f32 %v172_v25, %v165_v24 }
  0x59   :  { %v174_v28 = vadd.f32 %v173_v27, %v166_v26 }
  0x5b   :  { %176 = vst [vmem:[#allocation7] sm:$0xff] %v174_v28 }
  0x5c   :  { %321 = shalt.err (!%p318_p0)
}
  0x5d   :  { %s322_s25 = scalar_lea.hbm %s473_s2, 128 }
  0x5e   :  { %p323_p1 = scmp.ne.s32.totalorder %s473_s2, %s322_s25  ;;  %p326_p2 = scmp.lt.u32.totalorder %s322_s25, %s473_s2 }
  0x60   :  { %p328_p3 = pnand %p326_p2, %p323_p1 }
  0x62   :  { %331 = shalt.err (!%p328_p3)
}
  0x63   :  { %192 = dma.vmem_to_hbm [thread:$0]  %s190_s21, 128, %s473_s2, [#allocation4]  }
  0x64   :  { %336 = dma.done.wait [#allocation4], 128  }
  0x65   :  { %337 = vsyncadd [#allocation4], 4294967168 }
  0x66   :  { %338 = dma.done.wait [#allocation9], 128  }
  0x67   :  { %339 = vsyncadd [#allocation9], 4294967168 }
  0x68   :  { %209 = vsyncpa [#allocation3], 1 }
  0x69   :  { %210 = vsyncpa [#allocation6], 1 }
  0x6a   :  { %211 = vsyncpa [#allocation4], 1 }
  0x6b   :  { %212 = vsyncpa [#allocation9], 1 }

</bundles_post_ra>
